<compile_context>
chip_gen: v7x
topology: tpu7x:2x2x1
jax: 0.10.0
libtpu: 0.0.40
codegen_flags: <defaults>
</compile_context>

<pallas_src>
import functools

import jax
import jax.numpy as jnp
import numpy as np
from jax.experimental import pallas as pl
from jax.experimental.pallas import tpu as pltpu

LN_EPS = 1e-5


def _layer_norm(h, gamma, beta):
    mu = jnp.mean(h, axis=-1, keepdims=True)
    var = jnp.mean(jnp.square(h - mu), axis=-1, keepdims=True)
    return (h - mu) * jax.lax.rsqrt(var + LN_EPS) * gamma + beta


def _diffpool_kernel(x_ref, adj_ref, w_ref, p_ref, out_ref, *, tb, n, d_out):
    """One grid step == TB batch elements, everything fused in VMEM.

    x_ref  : (tb*n, d_in)        bf16   node features, batch folded into rows
    adj_ref: (tb, n, n)          bf16
    w_ref  : (d_in, 2*d_out)     bf16   [Wz | Ws]
    p_ref  : (8, 2*d_out)        f32    rows: 0=bias, 1=gamma, 2=beta  ([z-half | s-half])
    out_ref: (1, 2*tb*d_out, d_out) f32 per batch elem: [s^T z ; s^T adj s] stacked on sublanes
    """
    f32 = jnp.float32
    bf16 = jnp.bfloat16

    p = p_ref[...]
    bias = p[0:1, :]
    gamma = p[1:2, :]
    beta = p[2:3, :]

    # (1) one wide projection matmul for BOTH GCN branches over the whole batch tile
    #     (adj @ x) @ [Wz|Ws]  ==  adj @ (x @ [Wz|Ws])
    xw = jnp.dot(x_ref[...], w_ref[...],
                 preferred_element_type=f32).astype(bf16)          # (tb*n, 2*d_out)

    # (2) per-graph aggregation adj[b] @ (x[b] @ W); results stacked back along sublanes
    g_parts = [
        jnp.dot(adj_ref[b], xw[b * n:(b + 1) * n, :],
                preferred_element_type=f32)
        for b in range(tb)
    ]
    g = jnp.concatenate(g_parts, axis=0)                            # (tb*n, 2*d_out) f32

    # bias  ->  dropout(eval) = identity  ->  relu
    g = jnp.maximum(g + bias, 0.0)

    # (3) per-branch LayerNorm (f32); softmax on the assignment branch (f32)
    z = _layer_norm(g[:, :d_out], gamma[:, :d_out], beta[:, :d_out])    # repre branch
    s = _layer_norm(g[:, d_out:], gamma[:, d_out:], beta[:, d_out:])    # embed branch
    s_max = jnp.max(s, axis=-1, keepdims=True)
    e = jnp.exp(s - s_max)
    s = e * pl.reciprocal(jnp.sum(e, axis=-1, keepdims=True), approx=True)

    s16 = s.astype(bf16)

    # (4) pooled outputs; adj @ s first, then both final products share the same s^T
    outs = []
    for b in range(tb):
        rows = slice(b * n, (b + 1) * n)
        s_b = s[rows, :]                                            # (n, d_out) f32
        z_b = z[rows, :]                                            # (n, d_out) f32
        as_b = jnp.dot(adj_ref[b], s16[rows, :],
                       preferred_element_type=f32)                  # adj @ s   (n, d_out)
        st_b = s_b.T                                                # (d_out, n) f32
        outs.append(jnp.dot(st_b, z_b, preferred_element_type=f32))     # s^T z
        outs.append(jnp.dot(st_b, as_b, preferred_element_type=f32))    # s^T adj s
    out_ref[0] = jnp.concatenate(outs, axis=0)                      # (2*tb*d_out, d_out)


def _pick_batch_tile(batch, n, d_in):
    if n % 8 != 0:
        # keep one grid step so every block equals the full array dims (always legal)
        return batch
    tb = 1
    for t in (16, 8, 4, 2, 1):
        if batch % t == 0:
            tb = t
            break
    # keep double-buffered bf16 input blocks comfortably inside scoped VMEM
    while tb > 1 and 2 * 2 * tb * n * (n + d_in) > (8 << 20):
        tb //= 2
    return tb


@jax.jit
def diffpool(x, adj, params):
    """x: (B, N, D_in) f32, adj: (B, N, N) f32.

    params: dict with
      wz, ws       : (D_in, D_out)  projection weights (repre / embed)
      bz, bs       : (1, D_out)     projection biases
      gz, gs       : (1, D_out)     layernorm gamma
      betaz, betas : (1, D_out)     layernorm beta
    Returns (x_out (B, D_out, D_out), adj_out (B, D_out, D_out)).
    """
    B, N, D_in = x.shape
    D_out = params["wz"].shape[1]
    TB = _pick_batch_tile(B, N, D_in)
    G = B // TB

    # fold both branches' projections into one wide matmul: W_cat = [Wz | Ws]
    w_cat = jnp.concatenate([params["wz"], params["ws"]], axis=1).astype(jnp.bfloat16)
    # pack the six small per-channel params into a single sublane-aligned (8, 2*D_out) tile
    p_cat = jnp.concatenate(
        [
            jnp.concatenate([params["bz"], params["bs"]], axis=-1),
            jnp.concatenate([params["gz"], params["gs"]], axis=-1),
            jnp.concatenate([params["betaz"], params["betas"]], axis=-1),
            jnp.zeros((5, 2 * D_out), jnp.float32),
        ],
        axis=0,
    )

    # bf16 streaming of the two big inputs (f32 accumulation inside the kernel)
    x2d = x.reshape(B * N, D_in).astype(jnp.bfloat16)
    adj16 = adj.astype(jnp.bfloat16)

    kernel = functools.partial(_diffpool_kernel, tb=TB, n=N, d_out=D_out)

    grid_spec = pltpu.PrefetchScalarGridSpec(
        num_scalar_prefetch=0,
        grid=(G,),
        in_specs=[
            pl.BlockSpec((TB * N, D_in), lambda g: (g, 0)),         # x (batch folded in rows)
            pl.BlockSpec((TB, N, N), lambda g: (g, 0, 0)),          # adj
            pl.BlockSpec((D_in, 2 * D_out), lambda g: (0, 0)),      # [Wz | Ws]
            pl.BlockSpec((8, 2 * D_out), lambda g: (0, 0)),         # packed bias/gamma/beta
        ],
        out_specs=pl.BlockSpec((1, 2 * TB * D_out, D_out), lambda g: (g, 0, 0)),
    )

    # rough per-step VMEM need (double-buffered in/out + params), with headroom
    step_bytes = (2 * (TB * N * N + TB * N * D_in) * 2
                  + 2 * (2 * TB * D_out * D_out) * 4
                  + (D_in * 2 * D_out) * 2 + 8 * 2 * D_out * 4)
    vmem_limit = int(min(max(4 * step_bytes, 32 << 20), 64 << 20))

    out = pl.pallas_call(
        kernel,
        out_shape=jax.ShapeDtypeStruct((G, 2 * TB * D_out, D_out), jnp.float32),
        grid_spec=grid_spec,
        compiler_params=pltpu.CompilerParams(
            dimension_semantics=("parallel",),
            vmem_limit_bytes=vmem_limit,
        ),
    )(x2d, adj16, w_cat, p_cat)

    # unpack: rows per batch element are [x_pool (D_out rows); adj_pool (D_out rows)]
    out = out.reshape(G, TB, 2, D_out, D_out)
    x_out = out[:, :, 0].reshape(B, D_out, D_out)
    adj_out = out[:, :, 1].reshape(B, D_out, D_out)
    return x_out, adj_out


def init_params(key, input_size, output_size):
    k = jax.random.split(key, 4)
    scale = 1.0 / jnp.sqrt(jnp.float32(input_size))
    return {
        # repre GCN
        "wz": jax.random.normal(k[0], (input_size, output_size), jnp.float32) * scale,
        "bz": jnp.zeros((1, output_size), jnp.float32),
        "gz": jnp.ones((1, output_size), jnp.float32),
        "betaz": jnp.zeros((1, output_size), jnp.float32),
        # embed GCN
        "ws": jax.random.normal(k[1], (input_size, output_size), jnp.float32) * scale,
        "bs": jnp.zeros((1, output_size), jnp.float32),
        "gs": jnp.ones((1, output_size), jnp.float32),
        "betas": jnp.zeros((1, output_size), jnp.float32),
    }


def _reference(x, adj, params):
    """Pure-JAX f32 reference of the PyTorch forward (eval-mode dropout)."""
    def gcn(w, b, gamma, beta):
        h = jnp.einsum("bnm,bmd->bnd", adj, x) @ w + b
        h = jnp.maximum(h, 0.0)
        mu = jnp.mean(h, axis=-1, keepdims=True)
        var = jnp.mean(jnp.square(h - mu), axis=-1, keepdims=True)
        return (h - mu) / jnp.sqrt(var + LN_EPS) * gamma + beta

    z = gcn(params["wz"], params["bz"], params["gz"], params["betaz"])
    s = gcn(params["ws"], params["bs"], params["gs"], params["betas"])
    s = jax.nn.softmax(s, axis=-1)
    st = jnp.swapaxes(s, -1, -2)
    x_out = jnp.einsum("bcn,bnd->bcd", st, z)
    adj_out = jnp.einsum("bcn,bnm,bmd->bcd", st, adj, s)
    return x_out, adj_out


if __name__ == "__main__":
    B, N = 2, 16
    input_size, output_size = 32, 8

    key = jax.random.PRNGKey(0)
    kx, kadj, kp = jax.random.split(key, 3)

    x = jax.random.normal(kx, (B, N, input_size), jnp.float32)
    # symmetric, positive adjacency
    a = jax.random.uniform(kadj, (B, N, N), jnp.float32)
    adj = 0.5 * (a + jnp.swapaxes(a, -1, -2))

    params = init_params(kp, input_size, output_size)

    x_out, adj_out = diffpool(x, adj, params)
    jax.block_until_ready((x_out, adj_out))

    assert x_out.shape == (B, output_size, output_size)
    assert adj_out.shape == (B, output_size, output_size)

    # loose tolerance: kernel streams x/adj/W in bf16 (f32 accumulation / LN / softmax)
    ref_x, ref_adj = _reference(x, adj, params)
    np.testing.assert_allclose(np.asarray(x_out), np.asarray(ref_x), rtol=0.15, atol=0.25)
    np.testing.assert_allclose(np.asarray(adj_out), np.asarray(ref_adj), rtol=0.15, atol=0.25)

    print("KERNEL_OK")
</pallas_src>

<mosaic_0001>
module attributes {stable_mosaic.version = 11 : i64} {
  func.func @_diffpool_kernel(%arg0: i32, %arg1: memref<32x32xbf16, #tpu.memory_space<vmem>>, %arg2: memref<2x16x16xbf16, #tpu.memory_space<vmem>>, %arg3: memref<32x16xbf16, #tpu.memory_space<vmem>>, %arg4: memref<8x16xf32, #tpu.memory_space<vmem>>, %arg5: memref<1x32x8xf32, #tpu.memory_space<vmem>>) attributes {dimension_semantics = [#tpu.dimension_semantics<parallel>], iteration_bounds = array<i64: 1>, scalar_prefetch = 0 : i64, scratch_operands = 0 : i64, tpu.core_type = #tpu.core_type<tc>, window_params = [{transform_indices = @transform_0, window_bounds = array<i64: 32, 32>}, {transform_indices = @transform_1, window_bounds = array<i64: 2, 16, 16>}, {pipeline_mode = #tpu.pipeline_mode<synchronous>, transform_indices = @transform_2, window_bounds = array<i64: 32, 16>}, {pipeline_mode = #tpu.pipeline_mode<synchronous>, transform_indices = @transform_3, window_bounds = array<i64: 8, 16>}, {transform_indices = @transform_4, window_bounds = array<i64: 1, 32, 8>}]} {
    %c0 = arith.constant 0 : index
    %c0_0 = arith.constant 0 : index
    %0 = vector.load %arg4[%c0, %c0_0] : memref<8x16xf32, #tpu.memory_space<vmem>>, vector<8x16xf32>
    %1 = vector.extract_strided_slice %0 {offsets = [0, 0], sizes = [1, 16], strides = [1, 1]} : vector<8x16xf32> to vector<1x16xf32>
    %2 = vector.extract_strided_slice %0 {offsets = [1, 0], sizes = [1, 16], strides = [1, 1]} : vector<8x16xf32> to vector<1x16xf32>
    %3 = vector.extract_strided_slice %0 {offsets = [2, 0], sizes = [1, 16], strides = [1, 1]} : vector<8x16xf32> to vector<1x16xf32>
    %c0_1 = arith.constant 0 : index
    %c0_2 = arith.constant 0 : index
    %4 = vector.load %arg1[%c0_1, %c0_2] : memref<32x32xbf16, #tpu.memory_space<vmem>>, vector<32x32xbf16>
    %c0_3 = arith.constant 0 : index
    %c0_4 = arith.constant 0 : index
    %5 = vector.load %arg3[%c0_3, %c0_4] : memref<32x16xbf16, #tpu.memory_space<vmem>>, vector<32x16xbf16>
    %cst = arith.constant dense<0.000000e+00> : vector<32x16xf32>
    %6 = tpu.matmul %4, %5, %cst {dimension_numbers = #tpu.dot_dimension_numbers<[1], [0], [0], [1], [0, 0, 1, 1], [], []>} : vector<32x32xbf16>, vector<32x16xbf16>, vector<32x16xf32> -> vector<32x16xf32>
    %7 = arith.truncf %6 : vector<32x16xf32> to vector<32x16xbf16>
    %c0_5 = arith.constant 0 : index
    %c0_6 = arith.constant 0 : index
    %c0_7 = arith.constant 0 : index
    %8 = vector.load %arg2[%c0_5, %c0_6, %c0_7] : memref<2x16x16xbf16, #tpu.memory_space<vmem>>, vector<1x16x16xbf16>
    %9 = vector.shape_cast %8 : vector<1x16x16xbf16> to vector<16x16xbf16>
    %10 = vector.extract_strided_slice %7 {offsets = [0, 0], sizes = [16, 16], strides = [1, 1]} : vector<32x16xbf16> to vector<16x16xbf16>
    %cst_8 = arith.constant dense<0.000000e+00> : vector<16x16xf32>
    %11 = tpu.matmul %9, %10, %cst_8 {dimension_numbers = #tpu.dot_dimension_numbers<[1], [0], [0], [1], [0, 0, 1, 1], [], []>} : vector<16x16xbf16>, vector<16x16xbf16>, vector<16x16xf32> -> vector<16x16xf32>
    %c1 = arith.constant 1 : index
    %c0_9 = arith.constant 0 : index
    %c0_10 = arith.constant 0 : index
    %12 = vector.load %arg2[%c1, %c0_9, %c0_10] : memref<2x16x16xbf16, #tpu.memory_space<vmem>>, vector<1x16x16xbf16>
    %13 = vector.shape_cast %12 : vector<1x16x16xbf16> to vector<16x16xbf16>
    %14 = vector.extract_strided_slice %7 {offsets = [16, 0], sizes = [16, 16], strides = [1, 1]} : vector<32x16xbf16> to vector<16x16xbf16>
    %cst_11 = arith.constant dense<0.000000e+00> : vector<16x16xf32>
    %15 = tpu.matmul %13, %14, %cst_11 {dimension_numbers = #tpu.dot_dimension_numbers<[1], [0], [0], [1], [0, 0, 1, 1], [], []>} : vector<16x16xbf16>, vector<16x16xbf16>, vector<16x16xf32> -> vector<16x16xf32>
    %16 = tpu.concatenate %11, %15 in 0 : vector<16x16xf32>, vector<16x16xf32> -> vector<32x16xf32>
    %17 = vector.broadcast %1 : vector<1x16xf32> to vector<32x16xf32>
    %18 = arith.addf %16, %17 : vector<32x16xf32>
    %cst_12 = arith.constant 0.000000e+00 : f32
    %19 = vector.broadcast %cst_12 : f32 to vector<32x16xf32>
    %20 = arith.maximumf %18, %19 : vector<32x16xf32>
    %21 = vector.extract_strided_slice %20 {offsets = [0, 0], sizes = [32, 8], strides = [1, 1]} : vector<32x16xf32> to vector<32x8xf32>
    %22 = vector.extract_strided_slice %2 {offsets = [0, 0], sizes = [1, 8], strides = [1, 1]} : vector<1x16xf32> to vector<1x8xf32>
    %23 = vector.extract_strided_slice %3 {offsets = [0, 0], sizes = [1, 8], strides = [1, 1]} : vector<1x16xf32> to vector<1x8xf32>
    %cst_13 = arith.constant dense<0.000000e+00> : vector<32xf32>
    %24 = vector.multi_reduction <add>, %21, %cst_13 [1] : vector<32x8xf32> to vector<32xf32>
    %25 = vector.shape_cast %24 : vector<32xf32> to vector<32x1xf32>
    %cst_14 = arith.constant 8.000000e+00 : f32
    %26 = vector.broadcast %cst_14 : f32 to vector<32x1xf32>
    %27 = arith.divf %25, %26 : vector<32x1xf32>
    %28 = vector.broadcast %27 : vector<32x1xf32> to vector<32x8xf32>
    %29 = arith.subf %21, %28 : vector<32x8xf32>
    %30 = arith.mulf %29, %29 : vector<32x8xf32>
    %cst_15 = arith.constant dense<0.000000e+00> : vector<32xf32>
    %31 = vector.multi_reduction <add>, %30, %cst_15 [1] : vector<32x8xf32> to vector<32xf32>
    %32 = vector.shape_cast %31 : vector<32xf32> to vector<32x1xf32>
    %cst_16 = arith.constant 8.000000e+00 : f32
    %33 = vector.broadcast %cst_16 : f32 to vector<32x1xf32>
    %34 = arith.divf %32, %33 : vector<32x1xf32>
    %35 = vector.broadcast %27 : vector<32x1xf32> to vector<32x8xf32>
    %36 = arith.subf %21, %35 : vector<32x8xf32>
    %cst_17 = arith.constant 9.99999974E-6 : f32
    %37 = vector.broadcast %cst_17 : f32 to vector<32x1xf32>
    %38 = arith.addf %34, %37 : vector<32x1xf32>
    %39 = math.rsqrt %38 : vector<32x1xf32>
    %40 = vector.broadcast %39 : vector<32x1xf32> to vector<32x8xf32>
    %41 = arith.mulf %36, %40 : vector<32x8xf32>
    %42 = vector.broadcast %22 : vector<1x8xf32> to vector<32x8xf32>
    %43 = arith.mulf %41, %42 : vector<32x8xf32>
    %44 = vector.broadcast %23 : vector<1x8xf32> to vector<32x8xf32>
    %45 = arith.addf %43, %44 : vector<32x8xf32>
    %46 = vector.extract_strided_slice %20 {offsets = [0, 8], sizes = [32, 8], strides = [1, 1]} : vector<32x16xf32> to vector<32x8xf32>
    %47 = vector.extract_strided_slice %2 {offsets = [0, 8], sizes = [1, 8], strides = [1, 1]} : vector<1x16xf32> to vector<1x8xf32>
    %48 = vector.extract_strided_slice %3 {offsets = [0, 8], sizes = [1, 8], strides = [1, 1]} : vector<1x16xf32> to vector<1x8xf32>
    %cst_18 = arith.constant dense<0.000000e+00> : vector<32xf32>
    %49 = vector.multi_reduction <add>, %46, %cst_18 [1] : vector<32x8xf32> to vector<32xf32>
    %50 = vector.shape_cast %49 : vector<32xf32> to vector<32x1xf32>
    %cst_19 = arith.constant 8.000000e+00 : f32
    %51 = vector.broadcast %cst_19 : f32 to vector<32x1xf32>
    %52 = arith.divf %50, %51 : vector<32x1xf32>
    %53 = vector.broadcast %52 : vector<32x1xf32> to vector<32x8xf32>
    %54 = arith.subf %46, %53 : vector<32x8xf32>
    %55 = arith.mulf %54, %54 : vector<32x8xf32>
    %cst_20 = arith.constant dense<0.000000e+00> : vector<32xf32>
    %56 = vector.multi_reduction <add>, %55, %cst_20 [1] : vector<32x8xf32> to vector<32xf32>
    %57 = vector.shape_cast %56 : vector<32xf32> to vector<32x1xf32>
    %cst_21 = arith.constant 8.000000e+00 : f32
    %58 = vector.broadcast %cst_21 : f32 to vector<32x1xf32>
    %59 = arith.divf %57, %58 : vector<32x1xf32>
    %60 = vector.broadcast %52 : vector<32x1xf32> to vector<32x8xf32>
    %61 = arith.subf %46, %60 : vector<32x8xf32>
    %cst_22 = arith.constant 9.99999974E-6 : f32
    %62 = vector.broadcast %cst_22 : f32 to vector<32x1xf32>
    %63 = arith.addf %59, %62 : vector<32x1xf32>
    %64 = math.rsqrt %63 : vector<32x1xf32>
    %65 = vector.broadcast %64 : vector<32x1xf32> to vector<32x8xf32>
    %66 = arith.mulf %61, %65 : vector<32x8xf32>
    %67 = vector.broadcast %47 : vector<1x8xf32> to vector<32x8xf32>
    %68 = arith.mulf %66, %67 : vector<32x8xf32>
    %69 = vector.broadcast %48 : vector<1x8xf32> to vector<32x8xf32>
    %70 = arith.addf %68, %69 : vector<32x8xf32>
    %cst_23 = arith.constant dense<0xFF800000> : vector<32xf32>
    %71 = vector.multi_reduction <maximumf>, %70, %cst_23 [1] : vector<32x8xf32> to vector<32xf32>
    %72 = vector.shape_cast %71 : vector<32xf32> to vector<32x1xf32>
    %73 = vector.broadcast %72 : vector<32x1xf32> to vector<32x8xf32>
    %74 = arith.subf %70, %73 : vector<32x8xf32>
    %75 = math.exp %74 : vector<32x8xf32>
    %cst_24 = arith.constant dense<0.000000e+00> : vector<32xf32>
    %76 = vector.multi_reduction <add>, %75, %cst_24 [1] : vector<32x8xf32> to vector<32xf32>
    %77 = vector.shape_cast %76 : vector<32xf32> to vector<32x1xf32>
    %78 = tpu.reciprocal %77 {approx = true} : vector<32x1xf32> -> vector<32x1xf32>
    %79 = vector.broadcast %78 : vector<32x1xf32> to vector<32x8xf32>
    %80 = arith.mulf %75, %79 : vector<32x8xf32>
    %81 = arith.truncf %80 : vector<32x8xf32> to vector<32x8xbf16>
    %82 = vector.extract_strided_slice %80 {offsets = [0, 0], sizes = [16, 8], strides = [1, 1]} : vector<32x8xf32> to vector<16x8xf32>
    %83 = vector.extract_strided_slice %45 {offsets = [0, 0], sizes = [16, 8], strides = [1, 1]} : vector<32x8xf32> to vector<16x8xf32>
    %c0_25 = arith.constant 0 : index
    %c0_26 = arith.constant 0 : index
    %c0_27 = arith.constant 0 : index
    %84 = vector.load %arg2[%c0_25, %c0_26, %c0_27] : memref<2x16x16xbf16, #tpu.memory_space<vmem>>, vector<1x16x16xbf16>
    %85 = vector.shape_cast %84 : vector<1x16x16xbf16> to vector<16x16xbf16>
    %86 = vector.extract_strided_slice %81 {offsets = [0, 0], sizes = [16, 8], strides = [1, 1]} : vector<32x8xbf16> to vector<16x8xbf16>
    %cst_28 = arith.constant dense<0.000000e+00> : vector<16x8xf32>
    %87 = tpu.matmul %85, %86, %cst_28 {dimension_numbers = #tpu.dot_dimension_numbers<[1], [0], [0], [1], [0, 0, 1, 1], [], []>} : vector<16x16xbf16>, vector<16x8xbf16>, vector<16x8xf32> -> vector<16x8xf32>
    %88 = tpu.transpose %82, [1, 0] : vector<16x8xf32> -> vector<8x16xf32>
    %cst_29 = arith.constant dense<0.000000e+00> : vector<8x8xf32>
    %89 = tpu.matmul %88, %83, %cst_29 {dimension_numbers = #tpu.dot_dimension_numbers<[1], [0], [0], [1], [0, 0, 1, 1], [], []>} : vector<8x16xf32>, vector<16x8xf32>, vector<8x8xf32> -> vector<8x8xf32>
    %cst_30 = arith.constant dense<0.000000e+00> : vector<8x8xf32>
    %90 = tpu.matmul %88, %87, %cst_30 {dimension_numbers = #tpu.dot_dimension_numbers<[1], [0], [0], [1], [0, 0, 1, 1], [], []>} : vector<8x16xf32>, vector<16x8xf32>, vector<8x8xf32> -> vector<8x8xf32>
    %91 = vector.extract_strided_slice %80 {offsets = [16, 0], sizes = [16, 8], strides = [1, 1]} : vector<32x8xf32> to vector<16x8xf32>
    %92 = vector.extract_strided_slice %45 {offsets = [16, 0], sizes = [16, 8], strides = [1, 1]} : vector<32x8xf32> to vector<16x8xf32>
    %c1_31 = arith.constant 1 : index
    %c0_32 = arith.constant 0 : index
    %c0_33 = arith.constant 0 : index
    %93 = vector.load %arg2[%c1_31, %c0_32, %c0_33] : memref<2x16x16xbf16, #tpu.memory_space<vmem>>, vector<1x16x16xbf16>
    %94 = vector.shape_cast %93 : vector<1x16x16xbf16> to vector<16x16xbf16>
    %95 = vector.extract_strided_slice %81 {offsets = [16, 0], sizes = [16, 8], strides = [1, 1]} : vector<32x8xbf16> to vector<16x8xbf16>
    %cst_34 = arith.constant dense<0.000000e+00> : vector<16x8xf32>
    %96 = tpu.matmul %94, %95, %cst_34 {dimension_numbers = #tpu.dot_dimension_numbers<[1], [0], [0], [1], [0, 0, 1, 1], [], []>} : vector<16x16xbf16>, vector<16x8xbf16>, vector<16x8xf32> -> vector<16x8xf32>
    %97 = tpu.transpose %91, [1, 0] : vector<16x8xf32> -> vector<8x16xf32>
    %cst_35 = arith.constant dense<0.000000e+00> : vector<8x8xf32>
    %98 = tpu.matmul %97, %92, %cst_35 {dimension_numbers = #tpu.dot_dimension_numbers<[1], [0], [0], [1], [0, 0, 1, 1], [], []>} : vector<8x16xf32>, vector<16x8xf32>, vector<8x8xf32> -> vector<8x8xf32>
    %cst_36 = arith.constant dense<0.000000e+00> : vector<8x8xf32>
    %99 = tpu.matmul %97, %96, %cst_36 {dimension_numbers = #tpu.dot_dimension_numbers<[1], [0], [0], [1], [0, 0, 1, 1], [], []>} : vector<8x16xf32>, vector<16x8xf32>, vector<8x8xf32> -> vector<8x8xf32>
    %100 = tpu.concatenate %89, %90, %98, %99 in 0 : vector<8x8xf32>, vector<8x8xf32>, vector<8x8xf32>, vector<8x8xf32> -> vector<32x8xf32>
    %c0_37 = arith.constant 0 : index
    %c0_38 = arith.constant 0 : index
    %c0_39 = arith.constant 0 : index
    %101 = vector.load %arg5[%c0_37, %c0_38, %c0_39] : memref<1x32x8xf32, #tpu.memory_space<vmem>>, vector<1x32x8xf32>
    %102 = vector.shape_cast %101 : vector<1x32x8xf32> to vector<32x8xf32>
    %103 = vector.shape_cast %100 : vector<32x8xf32> to vector<1x32x8xf32>
    tpu.vector_store %arg5[%c0_37, %c0_38, %c0_39], %103 {strides = array<i32>} : memref<1x32x8xf32, #tpu.memory_space<vmem>>, vector<1x32x8xf32>,
    return
  }
  func.func @transform_0(%arg0: i32) -> (i32, i32) {
    %c0_i32 = arith.constant 0 : i32
    %c0_i32_0 = arith.constant 0 : i32
    return %arg0, %c0_i32 : i32, i32
  }
  func.func @transform_1(%arg0: i32) -> (i32, i32, i32) {
    %c0_i32 = arith.constant 0 : i32
    %c0_i32_0 = arith.constant 0 : i32
    %c0_i32_1 = arith.constant 0 : i32
    return %arg0, %c0_i32, %c0_i32_0 : i32, i32, i32
  }
  func.func @transform_2(%arg0: i32) -> (i32, i32) {
    %c0_i32 = arith.constant 0 : i32
    %c0_i32_0 = arith.constant 0 : i32
    %c0_i32_1 = arith.constant 0 : i32
    return %c0_i32, %c0_i32_0 : i32, i32
  }
  func.func @transform_3(%arg0: i32) -> (i32, i32) {
    %c0_i32 = arith.constant 0 : i32
    %c0_i32_0 = arith.constant 0 : i32
    %c0_i32_1 = arith.constant 0 : i32
    return %c0_i32, %c0_i32_0 : i32, i32
  }
  func.func @transform_4(%arg0: i32) -> (i32, i32, i32) {
    %c0_i32 = arith.constant 0 : i32
    %c0_i32_0 = arith.constant 0 : i32
    %c0_i32_1 = arith.constant 0 : i32
    return %arg0, %c0_i32, %c0_i32_0 : i32, i32, i32
  }
}

</mosaic_0001>

<bundles_post_ra>
// kernel: diffpool.1
= control target key start
LH: loop header
LB: loop body
LE: loop exit
PB: predicated region body
PF: predicated region fallthrough
CT: control target
= control target key end

     0   :  { %vm49_vm0 = vcmask 261120   ;;  %v1068_v4 = vmov 0.0   ;;  %vm1069_vm1 = vmmov 0   ;;  %vm114_vm2 = vcmask 130048   ;;  %s1260_s2 = inlined_call_operand.vmem [shape: bf16[32,16], index: 2, kind: input, shape index: {}]   ;;  %s1261_s0 = inlined_call_operand.vmem [shape: bf16[32,32], index: 0, kind: input, shape index: {}]   ;;  %s1262_s1 = inlined_call_operand.vmem [shape: bf16[2,16,16], index: 1, kind: input, shape index: {}]   ;;  %s1263_s3 = inlined_call_operand.vmem [shape: f32[8,16], index: 3, kind: input, shape index: {}]   ;;  %s1264_s4 = inlined_call_operand.vmem [shape: f32[1,32,8], index: 4, kind: output, shape index: {}]  }
   0x1   :  { %v1030_v0 = vld [vmem:[%s1260_s2] sm:$0xff]   ;;  %v1031_v1 = vld [vmem:[%s1260_s2 + $0x8] sm:$0xff]   ;;  %962 = vmatprep.subr.bf16.mxu1 %v1068_v4  ;;  %964 = vmatprep.mubr.msk.bf16.mxu1 %vm1069_vm1, %v1068_v4  ;;  %v211_v13 = vlaneseq  ;;  %vm223_vm3 = vcmask 64512   ;;  %vm385_vm4 = vcmask 130112  }
   0x2   :  { %954 = vmatprep.subr.bf16.mxu0 %v1030_v0  ;;  %v1032_v2 = vld [vmem:[%s1261_s0] sm:$0xff]   ;;  %v1033_v3 = vld [vmem:[%s1261_s0 + $0x8] sm:$0xff]  }
   0x3   :  { %955 = vmatpush3.bf16.msra.mxu0 %v1030_v0  ;;  %958 = vmatprep.mubr.msk.bf16.mxu0 %vm49_vm0, %v1032_v2  ;;  %v1118_v11 = vld [vmem:[%s1262_s1] sm:$0xff]   ;;  %v1128_v12 = vld [vmem:[%s1262_s1 + $0x8] sm:$0xff]   ;;  %v212_v14 = vshrl.u32 %v211_v13, 7  ;;  %s1070_s1 = smov 120  }
   0x4   :  { %956 = vmatprep.subr.bf16.mxu0 %v1031_v1  ;;  %v18_v17 = vld [vmem:[%s1263_s3] sm:$0xff] }
   0x5   :  { %v279_v15 = vsub.s32 1, %v212_v14  ;;  %v287_v16 = vsub.s32 2, %v212_v14  ;;  %v213_v20 = vsub.s32 0, %v212_v14 }
   0x7   :  { %957 = vmatpush3.bf16.msra.mxu0 %v1031_v1  ;;  %v1137_v18 = vrot.slane %v18_v17, %v279_v15  ;;  %v1139_v19 = vrot.slane %v18_v17, %v287_v16  ;;  %v214_v21 = vrot.slane %v18_v17, %v213_v20 }
   0x8   :  { %974 = vmatprep.subr.bf16.mxu0 %v1068_v4 }
   0xa   :  { %959 = vmatmul.mubr.msk.bf16.vlgmr.msra.gmra.mrb[0].mxu0 %vm49_vm0, %v1033_v3 }
   0xb   :  { %976 = vmatprep.mubr.msk.bf16.mxu0 %vm1069_vm1, %v1068_v4 }
  0xdd   :  { %v960_v5 = vpop.f32.mrb[0].mxu0 }
  0xde   :  { %v90_v6 = vpop.f32.mrb[1].mxu0 }
  0xdf   :  { %v961_v7 = vpop.f32.mrb[2].mxu0 }
  0xe0   :  { %v106_v8 = vpack.c.bf16 %v961_v7, %v960_v5  ;;  %v93_v9 = vpop.f32.mrb[3].mxu0 }
  0xe1   :  { %v105_v10 = vpack.c.bf16 %v93_v9, %v90_v6 }
  0xe3   :  { %963 = vmatpush3.bf16.msra.mxu1 %v105_v10 }
  0xe4   :  { %968 = vmatprep.subr.bf16.mxu1 %v1068_v4 }
  0xe6   :  { %965 = vmatmul.mubr.msk.bf16.vlgmr.msra.gmra.mrb[0].mxu1 %vm114_vm2, %v1118_v11 }
  0xe7   :  { %969 = vmatpush3.bf16.msra.mxu1 %v106_v8  ;;  %970 = vmatprep.mubr.msk.bf16.mxu1 %vm1069_vm1, %v1068_v4 }
  0xee   :  { %971 = vmatmul.mubr.msk.bf16.vlgmr.msra.gmra.mrb[4].mxu1 %vm114_vm2, %v1128_v12 }
  0xef   :  { %984 = vmatprep.mubr.msk.f32.mxu1 %vm1069_vm1, %v1068_v4 }
 0x1b9   :  { %v152_v22 = vpop.f32.mrb[0].mxu1 }
 0x1ba   :  { %v215_v23 = vadd.f32 %v214_v21, %v152_v22  ;;  %v966_v24 = vpop.f32.mrb[1].mxu1 }
 0x1bb   :  { %v155_v25 = vpop.f32.mrb[2].mxu1 }
 0x1bc   :  { %v1141_v26 = vmax.f32 %v215_v23, 0.0  ;;  %v216_v27 = vadd.f32 %v214_v21, %v155_v25  ;;  %v967_v28 = vpop.f32.mrb[3].mxu1 }
 0x1be   :  { %297 = vrot.lane.b32.xlu0 %v1141_v26, %s1070_s1  ;;  %v1145_v29 = vmax.f32 %v216_v27, 0.0 }
 0x1c1   :  { %v204_v30 = vpop.f32.mrb[4].mxu1 }
 0x1c2   :  { %v217_v31 = vadd.f32 %v214_v21, %v204_v30  ;;  %299 = vrot.lane.b32.xlu0 %v1145_v29, %s1070_s1  ;;  %v972_v32 = vpop.f32.mrb[5].mxu1 }
 0x1c3   :  { %v207_v33 = vpop.f32.mrb[6].mxu1 }
 0x1c4   :  { %v1149_v34 = vmax.f32 %v217_v31, 0.0  ;;  %v218_v35 = vadd.f32 %v214_v21, %v207_v33  ;;  %v973_v36 = vpop.f32.mrb[7].mxu1 }
 0x1c6   :  { %v1151_v37 = vmax.f32 %v218_v35, 0.0  ;;  %301 = vrot.lane.b32.xlu1 %v1149_v34, %s1070_s1 }
 0x1ca   :  { %303 = vrot.lane.b32.xlu1 %v1151_v37, %s1070_s1 }
 0x230   :  { %v298_v38 = vpop.permute.xlu0 %297 }
 0x231   :  { %v309_v39 = vsel %vm223_vm3, %v298_v38, 0.0 }
 0x232   :  { %310 = vadd.xlane.f32.xlu0 %v309_v39 }
 0x234   :  { %v300_v40 = vpop.permute.xlu0 %299 }
 0x235   :  { %v312_v41 = vsel %vm223_vm3, %v300_v40, 0.0 }
 0x236   :  { %313 = vadd.xlane.f32.xlu1 %v312_v41 }
 0x238   :  { %v302_v42 = vpop.permute.xlu1 %301 }
 0x239   :  { %v315_v43 = vsel %vm223_vm3, %v302_v42, 0.0 }
 0x23a   :  { %316 = vadd.xlane.f32.xlu0 %v315_v43 }
 0x23c   :  { %v304_v44 = vpop.permute.xlu1 %303 }
 0x23d   :  { %v318_v45 = vsel %vm223_vm3, %v304_v44, 0.0 }
 0x23e   :  { %319 = vadd.xlane.f32.xlu0 %v318_v45 }
 0x2bf   :  { %v311_v46 = vpop.xlane.xlu0 %310 }
 0x2c0   :  { %v321_v47 = vmul.f32 0.125, %v311_v46 }
 0x2c2   :  { %v325_v48 = vsub.f32 %v1141_v26, %v321_v47 }
 0x2c3   :  { %v314_v49 = vpop.xlane.xlu1 %313 }
 0x2c4   :  { %v322_v50 = vmul.f32 0.125, %v314_v49  ;;  %v329_v51 = vmul.f32 %v325_v48, %v325_v48 }
 0x2c6   :  { %v326_v52 = vsub.f32 %v1145_v29, %v322_v50  ;;  %337 = vrot.lane.b32.xlu1 %v329_v51, %s1070_s1 }
 0x2c7   :  { %v317_v53 = vpop.xlane.xlu0 %316 }
 0x2c8   :  { %v323_v54 = vmul.f32 0.125, %v317_v53  ;;  %v330_v55 = vmul.f32 %v326_v52, %v326_v52 }
 0x2ca   :  { %v327_v56 = vsub.f32 %v1149_v34, %v323_v54  ;;  %339 = vrot.lane.b32.xlu0 %v330_v55, %s1070_s1 }
 0x2cb   :  { %v320_v57 = vpop.xlane.xlu0 %319 }
 0x2cc   :  { %v324_v58 = vmul.f32 0.125, %v320_v57  ;;  %v331_v59 = vmul.f32 %v327_v56, %v327_v56 }
 0x2ce   :  { %v328_v60 = vsub.f32 %v1151_v37, %v324_v58  ;;  %341 = vrot.lane.b32.xlu1 %v331_v59, %s1070_s1 }
 0x2d0   :  { %v332_v61 = vmul.f32 %v328_v60, %v328_v60 }
 0x2d2   :  { %343 = vrot.lane.b32.xlu1 %v332_v61, %s1070_s1 }
 0x338   :  { %v338_v62 = vpop.permute.xlu1 %337 }
 0x339   :  { %v349_v63 = vsel %vm223_vm3, %v338_v62, 0.0 }
 0x33a   :  { %350 = vadd.xlane.f32.xlu0 %v349_v63 }
 0x33c   :  { %v340_v0 = vpop.permute.xlu0 %339 }
 0x33d   :  { %v352_v1 = vsel %vm223_vm3, %v340_v0, 0.0 }
 0x33e   :  { %353 = vadd.xlane.f32.xlu1 %v352_v1 }
 0x340   :  { %v342_v2 = vpop.permute.xlu1 %341 }
 0x341   :  { %v355_v3 = vsel %vm223_vm3, %v342_v2, 0.0 }
 0x342   :  { %356 = vadd.xlane.f32.xlu0 %v355_v3  ;;  %v224_v3 = vsel %vm223_vm3, %v1141_v26, 0.0 }
 0x344   :  { %v344_v5 = vpop.permute.xlu1 %343 }
 0x345   :  { %v358_v6 = vsel %vm223_vm3, %v344_v5, 0.0 }
 0x346   :  { %359 = vadd.xlane.f32.xlu0 %v358_v6  ;;  %v227_v6 = vsel %vm223_vm3, %v1145_v29, 0.0 }
 0x3c7   :  { %v351_v7 = vpop.xlane.xlu0 %350 }
 0x3c8   :  { %v361_v8 = vmul.f32 0.125, %v351_v7 }
 0x3ca   :  { %v365_v9 = vadd.f32 1e-05, %v361_v8 }
 0x3cb   :  { %v354_v10 = vpop.xlane.xlu1 %353 }
 0x3cc   :  { %1036 = vrsqrt.f32 %v365_v9  ;;  %v362_v13 = vmul.f32 0.125, %v354_v10 }
 0x3ce   :  { %v366_v14 = vadd.f32 1e-05, %v362_v13 }
 0x3cf   :  { %v357_v15 = vpop.xlane.xlu0 %356 }
 0x3d0   :  { %1038 = vrsqrt.f32 %v366_v14  ;;  %v363_v16 = vmul.f32 0.125, %v357_v15 }
 0x3d2   :  { %v367_v17 = vadd.f32 1e-05, %v363_v16 }
 0x3d3   :  { %v360_v20 = vpop.xlane.xlu0 %359 }
 0x3d4   :  { %1040 = vrsqrt.f32 %v367_v17  ;;  %v364_v21 = vmul.f32 0.125, %v360_v20 }
 0x3d6   :  { %v1037_v22 = vpop.eup %1036  ;;  %v368_v23 = vadd.f32 1e-05, %v364_v21 }
 0x3d7   :  { %v373_v24 = vmul.f32 %v1037_v22, %v325_v48 }
 0x3d8   :  { %1042 = vrsqrt.f32 %v368_v23 }
 0x3d9   :  { %v377_v25 = vmul.f32 %v373_v24, %v1137_v18 }
 0x3da   :  { %v1039_v27 = vpop.eup %1038 }
 0x3db   :  { %v381_v28 = vadd.f32 %v377_v25, %v1139_v19  ;;  %v374_v30 = vmul.f32 %v1039_v27, %v326_v52 }
 0x3dd   :  { %v386_v31 = vsel %vm385_vm4, %v381_v28, -inf  ;;  %v378_v32 = vmul.f32 %v374_v30, %v1137_v18 }
 0x3de   :  { %v1041_v33 = vpop.eup %1040  ;;  %387 = vmax.xlane.f32.xlu1 %v386_v31 }
 0x3df   :  { %v382_v35 = vadd.f32 %v378_v32, %v1139_v19  ;;  %v375_v36 = vmul.f32 %v1041_v33, %v327_v56 }
 0x3e1   :  { %v389_v38 = vsel %vm385_vm4, %v382_v35, -inf  ;;  %v379_v39 = vmul.f32 %v375_v36, %v1137_v18 }
 0x3e2   :  { %v1043_v40 = vpop.eup %1042  ;;  %390 = vmax.xlane.f32.xlu0 %v389_v38 }
 0x3e3   :  { %v383_v41 = vadd.f32 %v379_v39, %v1139_v19  ;;  %v376_v42 = vmul.f32 %v1043_v40, %v328_v60  ;;  %v1071_v40 = vmov 0.0|0.0  }
 0x3e4   :  { %1014 = vmatprep.subr.bf16.mxu1 %v1071_v40 }
 0x3e5   :  { %v392_v43 = vsel %vm385_vm4, %v383_v41, -inf  ;;  %v380_v44 = vmul.f32 %v376_v42, %v1137_v18 }
 0x3e6   :  { %393 = vmax.xlane.f32.xlu1 %v392_v43 }
 0x3e7   :  { %v384_v45 = vadd.f32 %v380_v44, %v1139_v19 }
 0x3e9   :  { %v395_v46 = vsel %vm385_vm4, %v384_v45, -inf }
 0x3ea   :  { %396 = vmax.xlane.f32.xlu0 %v395_v46 }
 0x46b   :  { %v388_v47 = vpop.xlane.xlu1 %387 }
 0x46c   :  { %v398_v48 = vsub.f32 %v381_v28, %v388_v47 }
 0x46e   :  { %v402_v49 = vmul.f32 1.442695, %v398_v48 }
 0x46f   :  { %v391_v50 = vpop.xlane.xlu0 %390 }
 0x470   :  { %1044 = vpow2.f32 %v402_v49  ;;  %v399_v51 = vsub.f32 %v382_v35, %v391_v50 }
 0x472   :  { %v404_v52 = vmul.f32 1.442695, %v399_v51 }
 0x473   :  { %v394_v53 = vpop.xlane.xlu1 %393 }
 0x474   :  { %1046 = vpow2.f32 %v404_v52  ;;  %v400_v54 = vsub.f32 %v383_v41, %v394_v53  ;;  %v230_v41 = vsel %vm223_vm3, %v1149_v34, 0.0 }
 0x476   :  { %v406_v55 = vmul.f32 1.442695, %v400_v54 }
 0x477   :  { %v397_v56 = vpop.xlane.xlu0 %396 }
 0x478   :  { %1048 = vpow2.f32 %v406_v55  ;;  %v401_v57 = vsub.f32 %v384_v45, %v397_v56 }
 0x47a   :  { %v1045_v58 = vpop.eup %1044  ;;  %v408_v59 = vmul.f32 1.442695, %v401_v57 }
 0x47b   :  { %414 = vrot.lane.b32.xlu1 %v1045_v58, %s1070_s1 }
 0x47c   :  { %1050 = vpow2.f32 %v408_v59 }
 0x47e   :  { %v1047_v60 = vpop.eup %1046 }
 0x47f   :  { %416 = vrot.lane.b32.xlu0 %v1047_v60, %s1070_s1 }
 0x482   :  { %v1049_v61 = vpop.eup %1048 }
 0x483   :  { %418 = vrot.lane.b32.xlu1 %v1049_v61, %s1070_s1 }
 0x486   :  { %v1051_v62 = vpop.eup %1050 }
 0x487   :  { %420 = vrot.lane.b32.xlu1 %v1051_v62, %s1070_s1 }
 0x4ed   :  { %v415_v63 = vpop.permute.xlu1 %414 }
 0x4ee   :  { %v426_v0 = vsel %vm223_vm3, %v415_v63, 0.0 }
 0x4ef   :  { %427 = vadd.xlane.f32.xlu0 %v426_v0 }
 0x4f1   :  { %v417_v1 = vpop.permute.xlu0 %416 }
 0x4f2   :  { %v429_v2 = vsel %vm223_vm3, %v417_v1, 0.0 }
 0x4f3   :  { %430 = vadd.xlane.f32.xlu1 %v429_v2  ;;  %225 = vadd.xlane.f32.xlu0 %v224_v3 }
 0x4f5   :  { %v419_v5 = vpop.permute.xlu1 %418 }
 0x4f6   :  { %v432_v7 = vsel %vm223_vm3, %v419_v5, 0.0 }
 0x4f7   :  { %228 = vadd.xlane.f32.xlu0 %v227_v6  ;;  %433 = vadd.xlane.f32.xlu1 %v432_v7 }
 0x4f9   :  { %v421_v8 = vpop.permute.xlu1 %420 }
 0x4fa   :  { %v435_v9 = vsel %vm223_vm3, %v421_v8, 0.0 }
 0x4fb   :  { %436 = vadd.xlane.f32.xlu0 %v435_v9 }
 0x57c   :  { %v428_v10 = vpop.xlane.xlu0 %427 }
 0x57d   :  { %1052 = vrcp.f32 %v428_v10 }
 0x580   :  { %v226_v13 = vpop.xlane.xlu0 %225  ;;  %v431_v21 = vpop.xlane.xlu1 %430 }
 0x581   :  { %v237_v14 = vmul.f32 0.125, %v226_v13  ;;  %1054 = vrcp.f32 %v431_v21 }
 0x583   :  { %v241_v15 = vsub.f32 %v1141_v26, %v237_v14 }
 0x584   :  { %v229_v16 = vpop.xlane.xlu0 %228  ;;  %v434_v28 = vpop.xlane.xlu1 %433 }
 0x585   :  { %v238_v17 = vmul.f32 0.125, %v229_v16  ;;  %v245_v20 = vmul.f32 %v241_v15, %v241_v15 }
 0x587   :  { %v242_v22 = vsub.f32 %v1145_v29, %v238_v17  ;;  %v249_v23 = vsel %vm223_vm3, %v245_v20, 0.0  ;;  %v1053_v26 = vpop.eup %1052 }
 0x588   :  { %250 = vadd.xlane.f32.xlu1 %v249_v23  ;;  %v437_v25 = vpop.xlane.xlu0 %436  ;;  %v442_v31 = vmul.f32 %v1053_v26, %v1045_v58 }
 0x589   :  { %v246_v24 = vmul.f32 %v242_v22, %v242_v22  ;;  %1056 = vrcp.f32 %v437_v25 }
 0x58a   :  { %1058 = vrcp.f32 %v434_v28 }
 0x58b   :  { %v252_v27 = vsel %vm223_vm3, %v246_v24, 0.0  ;;  %v1055_v30 = vpop.eup %1054 }
 0x58c   :  { %253 = vadd.xlane.f32.xlu0 %v252_v27  ;;  %v443_v32 = vmul.f32 %v1055_v30, %v1047_v60 }
 0x58e   :  { %v446_v35 = vpack.c.bf16 %v443_v32, %v442_v31 }
 0x593   :  { %v1057_v33 = vpop.eup %1056 }
 0x594   :  { %v1059_v29 = vpop.eup %1058  ;;  %v445_v36 = vmul.f32 %v1057_v33, %v1051_v62 }
 0x595   :  { %v444_v38 = vmul.f32 %v1059_v29, %v1049_v61 }
 0x597   :  { %v447_v39 = vpack.c.bf16 %v445_v36, %v444_v38 }
 0x599   :  { %495 = vrot.lane.b32.xlu1 %v442_v31, %s1070_s1 }
 0x59d   :  { %449 = vrot.lane.b32.xlu1 %v446_v35, %s1070_s1 }
 0x5a1   :  { %677 = vrot.lane.b32.xlu1 %v447_v39, %s1070_s1 }
 0x5a2   :  { %497 = vrot.lane.b32.xlu0 %v443_v32, %s1070_s1 }
 0x5c5   :  { %231 = vadd.xlane.f32.xlu1 %v230_v41 }
 0x615   :  { %v251_v42 = vpop.xlane.xlu1 %250 }
 0x616   :  { %v261_v43 = vmul.f32 0.125, %v251_v42 }
 0x618   :  { %v265_v44 = vadd.f32 1e-05, %v261_v43 }
 0x619   :  { %v254_v45 = vpop.xlane.xlu0 %253  ;;  %v496_v46 = vpop.permute.xlu1 %495 }
 0x61a   :  { %1060 = vrsqrt.f32 %v265_v44  ;;  %v262_v47 = vmul.f32 0.125, %v254_v45  ;;  %501 = vxpose.xlu0.b32.start [1/2] (short) (narrow) %v496_v46, 8 }
 0x61c   :  { %v266_v48 = vadd.f32 1e-05, %v262_v47 }
 0x61d   :  { %v498_v49 = vpop.permute.xlu0 %497  ;;  %v450_v50 = vpop.permute.xlu1 %449 }
 0x61e   :  { %1062 = vrsqrt.f32 %v266_v48  ;;  %502 = vxpose.xlu0.b32.end [2/2] (short) (narrow) %v498_v49, 8  ;;  %975 = vmatpush3.bf16.msra.mxu0 %v450_v50 }
 0x61f   :  { %1017 = vmatprep.subr.bf16.mxu0 %v1071_v40 }
 0x621   :  { %977 = vmatmul.mubr.msk.bf16.vlgmr.msra.gmra.mrb[4].mxu0 %vm114_vm2, %v1118_v11  ;;  %v233_v11 = vsel %vm223_vm3, %v1151_v37, 0.0  ;;  %v678_v60 = vpop.permute.xlu1 %677 }
 0x622   :  { %991 = vmatprep.mubr.msk.f32.mxu0 %vm1069_vm1, %v1068_v4 }
 0x624   :  { %v1061_v51 = vpop.eup %1060 }
 0x625   :  { %v273_v52 = vmul.f32 %v1061_v51, %v241_v15 }
 0x627   :  { %v281_v55 = vmul.f32 %v1137_v18, %v273_v52 }
 0x628   :  { %v1063_v53 = vpop.eup %1062 }
 0x629   :  { %v274_v54 = vmul.f32 %v1063_v53, %v242_v22  ;;  %v289_v57 = vadd.f32 %v1139_v19, %v281_v55 }
 0x62b   :  { %v282_v56 = vmul.f32 %v1137_v18, %v274_v54 }
 0x62d   :  { %v290_v58 = vadd.f32 %v1139_v19, %v282_v56 }
 0x62f   :  { %v1015_v59 = vpack.c.bf16 %v290_v58, %v289_v57 }
 0x631   :  { %1016 = vmatpush3.bf16.msra.mxu1 %v1015_v59 }
 0x632   :  { %994 = vmatprep.subr.bf16.mxu1 %v1068_v4 }
 0x64b   :  { %234 = vadd.xlane.f32.xlu0 %v233_v11 }
 0x652   :  { %v232_v61 = vpop.xlane.xlu1 %231 }
 0x653   :  { %v239_v62 = vmul.f32 0.125, %v232_v61 }
 0x655   :  { %v243_v63 = vsub.f32 %v1149_v34, %v239_v62 }
 0x657   :  { %v247_v0 = vmul.f32 %v243_v63, %v243_v63 }
 0x659   :  { %v255_v1 = vsel %vm223_vm3, %v247_v0, 0.0 }
 0x65a   :  { %256 = vadd.xlane.f32.xlu1 %v255_v1 }
 0x69a   :  { %v517_v2 = vpop.trf.xlu0 }
 0x69b   :  { %985 = vmatmul.mubr.msk.f32.vlgmr.msra.gmra.mrb[8].mxu1 %vm114_vm2, %v517_v2 }
 0x69c   :  { %995 = vmatpush3.bf16.msra.mxu1 %v678_v60  ;;  %996 = vmatprep.mubr.msk.bf16.mxu1 %vm1069_vm1, %v1068_v4 }
 0x69f   :  { %997 = vmatmul.mubr.msk.bf16.vlgmr.msra.gmra.mrb[12].mxu1 %vm114_vm2, %v1128_v12 }
 0x6d8   :  { %v235_v3 = vpop.xlane.xlu0 %234 }
 0x6d9   :  { %v240_v5 = vmul.f32 0.125, %v235_v3 }
 0x6db   :  { %v244_v6 = vsub.f32 %v1151_v37, %v240_v5 }
 0x6dd   :  { %v248_v7 = vmul.f32 %v244_v6, %v244_v6 }
 0x6df   :  { %v258_v34 = vsel %vm223_vm3, %v248_v7, 0.0 }
 0x6e0   :  { %259 = vadd.xlane.f32.xlu1 %v258_v34 }
 0x6e7   :  { %v257_v12 = vpop.xlane.xlu1 %256 }
 0x6e8   :  { %v263_v37 = vmul.f32 0.125, %v257_v12 }
 0x6ea   :  { %v267_v15 = vadd.f32 1e-05, %v263_v37 }
 0x6ec   :  { %1064 = vrsqrt.f32 %v267_v15 }
 0x6f1   :  { %723 = vrot.lane.b32.xlu1 %v444_v38, %s1070_s1 }
 0x6f4   :  { %v486_v8 = vpop.f32.mrb[4].mxu0 }
 0x6f5   :  { %v978_v9 = vpop.f32.mrb[5].mxu0  ;;  %725 = vrot.lane.b32.xlu1 %v445_v36, %s1070_s1 }
 0x6f6   :  { %v489_v10 = vpop.f32.mrb[6].mxu0  ;;  %v1065_v31 = vpop.eup %1064 }
 0x6f7   :  { %v1018_v13 = vpack.c.bf16 %v489_v10, %v486_v8  ;;  %v979_v14 = vpop.f32.mrb[7].mxu0  ;;  %v275_v32 = vmul.f32 %v1065_v31, %v243_v63 }
 0x6f9   :  { %1019 = vmatpush3.bf16.msra.mxu0 %v1018_v13  ;;  %v283_v35 = vmul.f32 %v1137_v18, %v275_v32 }
 0x6fa   :  { %1020 = vmatprep.subr.bf16.mxu0 %v1071_v40 }
 0x6fb   :  { %v291_v38 = vadd.f32 %v1139_v19, %v283_v35 }
 0x6fc   :  { %992 = vmatmul.mubr.msk.f32.vlgmr.msra.gmra.mrb[8].mxu0 %vm114_vm2, %v517_v2 }
 0x6fd   :  { %1004 = vmatprep.mubr.msk.f32.mxu0 %vm1069_vm1, %v1068_v4 }
 0x76d   :  { %v260_v16 = vpop.xlane.xlu1 %259 }
 0x76e   :  { %v264_v17 = vmul.f32 0.125, %v260_v16  ;;  %v602_v20 = vpop.f32.mrb[8].mxu1 }
 0x76f   :  { %904 = vst.msk [vmem:[%s1264_s4] sm:$0xff] %vm223_vm3, %v602_v20  ;;  %v986_v21 = vpop.f32.mrb[9].mxu1 }
 0x770   :  { %v268_v22 = vadd.f32 1e-05, %v264_v17 }
 0x771   :  { %v724_v23 = vpop.permute.xlu1 %723 }
 0x772   :  { %1066 = vrsqrt.f32 %v268_v22  ;;  %729 = vxpose.xlu1.b32.start [1/2] (short) (narrow) %v724_v23, 8  ;;  %v714_v24 = vpop.f32.mrb[12].mxu1 }
 0x773   :  { %v998_v25 = vpop.f32.mrb[13].mxu1 }
 0x774   :  { %v717_v27 = vpop.f32.mrb[14].mxu1 }
 0x775   :  { %v726_v28 = vpop.permute.xlu1 %725  ;;  %v1024_v26 = vpack.c.bf16 %v717_v27, %v714_v24  ;;  %v999_v30 = vpop.f32.mrb[15].mxu1 }
 0x776   :  { %730 = vxpose.xlu1.b32.end [2/2] (short) (narrow) %v726_v28, 8 }
 0x77c   :  { %v1067_v33 = vpop.eup %1066 }
 0x77d   :  { %v276_v29 = vmul.f32 %v1067_v33, %v244_v6 }
 0x77f   :  { %v284_v36 = vmul.f32 %v1137_v18, %v276_v29 }
 0x781   :  { %v292_v39 = vadd.f32 %v1139_v19, %v284_v36 }
 0x783   :  { %v1021_v41 = vpack.c.bf16 %v292_v39, %v291_v38 }
 0x785   :  { %1022 = vmatpush3.bf16.msra.mxu0 %v1021_v41 }
 0x786   :  { %1023 = vmatprep.subr.bf16.mxu0 %v1071_v40 }
 0x7cf   :  { %v672_v42 = vpop.f32.mrb[8].mxu0 }
 0x7d0   :  { %905 = vst.msk [vmem:[%s1264_s4 + $0x8] sm:$0xff] %vm223_vm3, %v672_v42  ;;  %v993_v43 = vpop.f32.mrb[9].mxu0 }
 0x7f2   :  { %v745_v44 = vpop.trf.xlu1 }
 0x7f3   :  { %1005 = vmatmul.mubr.msk.f32.vlgmr.msra.gmra.mrb[10].mxu0 %vm114_vm2, %v745_v44 }
 0x7f4   :  { %1025 = vmatpush3.bf16.msra.mxu0 %v1024_v26  ;;  %1011 = vmatprep.mubr.msk.f32.mxu0 %vm1069_vm1, %v1068_v4 }
 0x7f7   :  { %1012 = vmatmul.mubr.msk.f32.vlgmr.msra.gmra.mrb[12].mxu0 %vm114_vm2, %v745_v44 }
 0x8c6   :  { %v830_v18 = vpop.f32.mrb[10].mxu0 }
 0x8c7   :  { %906 = vst.msk [vmem:[%s1264_s4 + $0x10] sm:$0xff] %vm223_vm3, %v830_v18  ;;  %v1006_v19 = vpop.f32.mrb[11].mxu0 }
 0x8ca   :  { %v900_v40 = vpop.f32.mrb[12].mxu0 }
 0x8cb   :  { %907 = vst.msk [vmem:[%s1264_s4 + $0x18] sm:$0xff] %vm223_vm3, %v900_v40  ;;  %v1013_v45 = vpop.f32.mrb[13].mxu0 }

</bundles_post_ra>
